<compile_context>
chip_gen: v5e
topology: v5e:2x2
jax: 0.10.0
libtpu: 0.0.40
codegen_flags: <defaults>
</compile_context>

<pallas_src>
import math

import jax
import jax.numpy as jnp
from jax.experimental import pallas as pl
from jax.experimental.pallas import tpu as pltpu

_LANE = 128
_SUBLANE = 8
_BLOCK_BYTES = 2 * 1024 * 1024      # per-block budget (before 2x pipelining)
_VMEM_LIMIT = 32 * 1024 * 1024      # safe on v5e/v6e (128 MiB) and v7x (64 MiB)
_UNROLL_MAX = 256                   # unroll the K scan up to this many slices


def _round_up(a: int, b: int) -> int:
    return (a + b - 1) // b * b


def _largest_divisor_leq(n: int, cap: int) -> int:
    cap = max(1, min(cap, n))
    for d in range(cap, 0, -1):
        if n % d == 0:
            return d
    return 1


def _lowest(dtype):
    if jnp.issubdtype(dtype, jnp.floating):
        return float("-inf")
    return int(jnp.iinfo(dtype).min)


# ---------------------------------------------------------------------------
# Kernels
# ---------------------------------------------------------------------------
def _scan_argmax_axis1(x_ref):
    """First-occurrence argmax over axis 1 of a (b, K, L) block ref.

    Running (max, argmax) compare chain over K slices of shape (b, L): pure
    VPU elementwise work, lane-dense, no cross-lane reductions or relayouts.
    NaN counts as maximal (first NaN wins), matching torch.argmax.
    Returns (argmax int32 (b, L), running max (b, L)).
    """
    k = x_ref.shape[1]
    best = x_ref[:, 0, :]
    best_idx = jnp.zeros(best.shape, jnp.int32)

    def step(kc_val, cur, best, best_idx):
        # strict '>' keeps the first occurrence; NaN replaces non-NaN only.
        take = (cur > best) | ((cur != cur) & (best == best))
        return jnp.where(take, cur, best), jnp.where(take, kc_val, best_idx)

    if k <= _UNROLL_MAX:
        for kc in range(1, k):
            best, best_idx = step(jnp.int32(kc), x_ref[:, kc, :],
                                  best, best_idx)
    else:
        def body(kc, carry):
            best, best_idx = carry
            cur = x_ref[:, pl.ds(kc, 1), :][:, 0, :]
            return step(kc.astype(jnp.int32), cur, best, best_idx)

        best, best_idx = jax.lax.fori_loop(1, k, body, (best, best_idx))
    return best_idx, best


def _argmax_mid_kernel(x_ref, o_ref):
    best_idx, _ = _scan_argmax_axis1(x_ref)      # (to, tl) int32, lane-dense
    o_ref[...] = best_idx


def _argmax_flat_kernel(x_ref, arg_ref, max_ref):
    best_idx, best = _scan_argmax_axis1(x_ref)   # (1, L) each
    arg_ref[...] = best_idx
    max_ref[...] = best


def _argmax_last_kernel(x_ref, o_ref):
    """Per-row argmax along the last (lane) axis, NaN == maximal."""
    x = x_ref[...]                                # (tm, K)
    k = x.shape[-1]
    sentinel = jnp.int32(k)
    idx = jax.lax.broadcasted_iota(jnp.int32, x.shape, 1)
    is_nan = x != x
    row_max = jnp.max(x, axis=-1, keepdims=True)
    first_nan = jnp.min(jnp.where(is_nan, idx, sentinel), axis=-1,
                        keepdims=True)
    first_max = jnp.min(jnp.where(x == row_max, idx, sentinel), axis=-1,
                        keepdims=True)
    o_ref[...] = jnp.where(first_nan < sentinel, first_nan,
                           first_max).astype(jnp.int32)


# ---------------------------------------------------------------------------
# pallas_call wrappers
# ---------------------------------------------------------------------------
def _argmax_mid(x3: jax.Array) -> jax.Array:
    """argmax over axis 1 of [outer, K, inner] -> int32 [outer, inner]."""
    outer, k, inner = x3.shape
    itemsize = x3.dtype.itemsize
    ebytes = max(itemsize, 4)                 # int32 intermediates dominate
    k_sub = _round_up(k, _SUBLANE)            # sublane padding in VMEM

    # Lane-unfriendly *and* huge inner: pad inner once so it can be tiled.
    if inner % _LANE != 0 and k_sub * inner * ebytes > 4 * _BLOCK_BYTES:
        inner_p = _round_up(inner, _LANE)
        x3p = jnp.pad(x3, ((0, 0), (0, 0), (0, inner_p - inner)))
        return _argmax_mid(x3p)[:, :inner]

    # Lane tile: largest multiple of 128 dividing inner that fits the budget,
    # otherwise the (lane-legal) full inner extent.
    if inner % _LANE == 0:
        tl = _LANE
        while (inner % (tl * 2) == 0 and tl * 2 <= min(inner, 2048)
               and k_sub * tl * 2 * ebytes <= _BLOCK_BYTES):
            tl *= 2
    else:
        tl = inner
    to_max = max(1, _BLOCK_BYTES // (k_sub * tl * ebytes))
    to = _largest_divisor_leq(outer, min(to_max, 256))

    grid = (outer // to, inner // tl)
    return pl.pallas_call(
        _argmax_mid_kernel,
        out_shape=jax.ShapeDtypeStruct((outer, inner), jnp.int32),
        grid_spec=pltpu.PrefetchScalarGridSpec(
            num_scalar_prefetch=0,
            grid=grid,
            in_specs=[pl.BlockSpec((to, k, tl), lambda i, j: (i, 0, j))],
            out_specs=pl.BlockSpec((to, tl), lambda i, j: (i, j)),
        ),
        compiler_params=pltpu.CompilerParams(
            dimension_semantics=("parallel", "parallel"),
            vmem_limit_bytes=_VMEM_LIMIT,
        ),
        cost_estimate=pl.CostEstimate(
            flops=6 * outer * k * inner,
            transcendentals=0,
            bytes_accessed=outer * k * inner * itemsize + outer * inner * 4,
        ),
    )(x3)


def _argmax_last(x2: jax.Array) -> jax.Array:
    """argmax over the last axis of [N, K] -> int32 [N]."""
    n, k = x2.shape
    itemsize = x2.dtype.itemsize
    ebytes = max(itemsize, 4)
    k_lane = _round_up(k, _LANE)              # VMEM pads the lane dim to 128
    # TODO(synk): for very large K (a single (8, K) block > ~16 MiB) tile K as
    # an extra "arbitrary" grid axis with running (max, argmax) scratch.
    tm = (_BLOCK_BYTES // (k_lane * ebytes)) // _SUBLANE * _SUBLANE
    tm = max(_SUBLANE, min(tm, 4096))
    if n <= tm:
        tm = n
        n_pad = n
    else:
        steps = max(2, pl.cdiv(n, tm))        # >= 2 steps keeps megacore busy
        tm = _round_up(pl.cdiv(n, steps), _SUBLANE)
        n_pad = _round_up(n, tm)
    xp = x2 if n_pad == n else jnp.pad(x2, ((0, n_pad - n), (0, 0)))

    out = pl.pallas_call(
        _argmax_last_kernel,
        out_shape=jax.ShapeDtypeStruct((n_pad, 1), jnp.int32),
        grid_spec=pltpu.PrefetchScalarGridSpec(
            num_scalar_prefetch=0,
            grid=(n_pad // tm,),
            in_specs=[pl.BlockSpec((tm, k), lambda i: (i, 0))],
            out_specs=pl.BlockSpec((tm, 1), lambda i: (i, 0)),
        ),
        compiler_params=pltpu.CompilerParams(
            dimension_semantics=("parallel",),
            vmem_limit_bytes=_VMEM_LIMIT,
        ),
        cost_estimate=pl.CostEstimate(
            flops=6 * n_pad * k,
            transcendentals=0,
            bytes_accessed=n_pad * k * itemsize + n_pad * 4,
        ),
    )(xp)
    return out[:n, 0]


def _argmax_flat(x: jax.Array) -> jax.Array:
    """Global argmax over all elements -> int32 scalar (flat index)."""
    total = int(x.size)
    flat = x.reshape(-1)
    itemsize = flat.dtype.itemsize

    lane = _LANE
    for cand in (512, 1024, 2048):
        if total >= cand * _SUBLANE:
            lane = cand
    kc = min(_UNROLL_MAX, max(_SUBLANE, pl.cdiv(total, lane)))
    kc = _round_up(kc, _SUBLANE)
    m = pl.cdiv(total, kc * lane)
    padded = m * kc * lane
    if padded > 2**31 - 1:
        # TODO(synk): int64 flat indices need jax_enable_x64 (torch uses int64).
        raise NotImplementedError("flat argmax over >= 2**31 elements")
    if padded != total:
        flat = jnp.pad(flat, (0, padded - total),
                       constant_values=_lowest(flat.dtype))
    x3 = flat.reshape(m, kc, lane)

    arg, mx = pl.pallas_call(
        _argmax_flat_kernel,
        out_shape=(jax.ShapeDtypeStruct((m, lane), jnp.int32),
                   jax.ShapeDtypeStruct((m, lane), flat.dtype)),
        grid_spec=pltpu.PrefetchScalarGridSpec(
            num_scalar_prefetch=0,
            grid=(m,),
            in_specs=[pl.BlockSpec((1, kc, lane), lambda i: (i, 0, 0))],
            out_specs=(pl.BlockSpec((1, lane), lambda i: (i, 0)),
                       pl.BlockSpec((1, lane), lambda i: (i, 0))),
        ),
        compiler_params=pltpu.CompilerParams(
            dimension_semantics=("parallel",),
            vmem_limit_bytes=_VMEM_LIMIT,
        ),
        cost_estimate=pl.CostEstimate(
            flops=6 * padded,
            transcendentals=0,
            bytes_accessed=padded * itemsize + m * lane * (4 + itemsize),
        ),
    )(x3)

    # Tiny second stage (~1/kc of the data): exact first-occurrence flat index.
    m_idx = jax.lax.broadcasted_iota(jnp.int32, (m, lane), 0)
    l_idx = jax.lax.broadcasted_iota(jnp.int32, (m, lane), 1)
    flat_idx = (m_idx * kc + arg) * lane + l_idx
    is_nan = mx != mx
    hit = jnp.where(jnp.any(is_nan), is_nan, mx == jnp.max(mx))
    return jnp.min(jnp.where(hit, flat_idx, jnp.int32(padded)))


# ---------------------------------------------------------------------------
# Public API (mirrors torchkit ArgMax.forward)
# ---------------------------------------------------------------------------
def arg_max(x: jax.Array, dim=None) -> jax.Array:
    """JAX/Pallas equivalent of torch.argmax(x, dim=dim). Returns int32."""
    x = jnp.asarray(x)
    if x.dtype == jnp.bool_:
        x = x.astype(jnp.int32)
    if dim is None:
        return _argmax_flat(x)
    dim = dim % x.ndim
    k = x.shape[dim]
    if dim == x.ndim - 1:
        outer = math.prod(x.shape[:-1])
        res = _argmax_last(x.reshape(outer, k))
    else:
        outer = math.prod(x.shape[:dim])
        inner = math.prod(x.shape[dim + 1:])
        res = _argmax_mid(x.reshape(outer, k, inner))
    return res.reshape(x.shape[:dim] + x.shape[dim + 1:])


class ArgMax:
    """Mirror of the torchkit ArgMax nn.Module (forward = torch.argmax)."""

    def __init__(self, dim=None):
        self.dim = dim

    def __call__(self, x):
        return arg_max(x, self.dim)


if __name__ == "__main__":
    key = jax.random.PRNGKey(0)
    x = jax.random.normal(key, (2, 4, 16, 16), dtype=jnp.float32)

    # ArgMax(dim=1): channel argmax of an NCHW tensor (mid-axis scan kernel).
    out_dim1 = jax.block_until_ready(ArgMax(dim=1)(x))
    ref_dim1 = jnp.argmax(x, axis=1).astype(jnp.int32)
    assert out_dim1.shape == (2, 16, 16)
    assert bool(jnp.all(out_dim1 == ref_dim1))

    # ArgMax(dim=-1): last-axis argmax (row-tile kernel).
    out_last = jax.block_until_ready(ArgMax(dim=-1)(x))
    ref_last = jnp.argmax(x, axis=-1).astype(jnp.int32)
    assert out_last.shape == (2, 4, 16)
    assert bool(jnp.all(out_last == ref_last))

    # ArgMax(dim=None): global argmax over the flattened tensor.
    out_none = jax.block_until_ready(ArgMax(dim=None)(x))
    ref_none = jnp.argmax(x).astype(jnp.int32)
    assert out_none.shape == ()
    assert bool(out_none == ref_none)

    print("KERNEL_OK")
</pallas_src>

<mosaic_0001>
module attributes {stable_mosaic.version = 11 : i64} {
  func.func @_argmax_mid_kernel(%arg0: i32, %arg1: i32, %arg2: memref<2x4x256xf32, #tpu.memory_space<vmem>>, %arg3: memref<2x256xi32, #tpu.memory_space<vmem>>) attributes {dimension_semantics = [#tpu.dimension_semantics<parallel>, #tpu.dimension_semantics<parallel>], iteration_bounds = array<i64: 1, 1>, scalar_prefetch = 0 : i64, scratch_operands = 0 : i64, tpu.core_type = #tpu.core_type<tc>, window_params = [{transform_indices = @transform_0, window_bounds = array<i64: 2, 4, 256>}, {transform_indices = @transform_1, window_bounds = array<i64: 2, 256>}]} {
    %c0 = arith.constant 0 : index
    %c0_0 = arith.constant 0 : index
    %c0_1 = arith.constant 0 : index
    %0 = vector.load %arg2[%c0, %c0_0, %c0_1] : memref<2x4x256xf32, #tpu.memory_space<vmem>>, vector<2x1x256xf32>
    %1 = vector.shape_cast %0 : vector<2x1x256xf32> to vector<2x256xf32>
    %c0_i32 = arith.constant 0 : i32
    %2 = vector.broadcast %c0_i32 : i32 to vector<2x256xi32>
    %c0_2 = arith.constant 0 : index
    %c1 = arith.constant 1 : index
    %c0_3 = arith.constant 0 : index
    %3 = vector.load %arg2[%c0_2, %c1, %c0_3] : memref<2x4x256xf32, #tpu.memory_space<vmem>>, vector<2x1x256xf32>
    %4 = vector.shape_cast %3 : vector<2x1x256xf32> to vector<2x256xf32>
    %5 = arith.cmpf ogt, %4, %1 : vector<2x256xf32>
    %6 = arith.cmpf one, %4, %4 : vector<2x256xf32>
    %7 = arith.cmpf oeq, %1, %1 : vector<2x256xf32>
    %8 = arith.andi %6, %7 : vector<2x256xi1>
    %9 = arith.ori %5, %8 : vector<2x256xi1>
    %10 = arith.select %9, %4, %1 : vector<2x256xi1>, vector<2x256xf32>
    %c1_i32 = arith.constant 1 : i32
    %11 = vector.broadcast %c1_i32 : i32 to vector<2x256xi32>
    %12 = arith.select %9, %11, %2 : vector<2x256xi1>, vector<2x256xi32>
    %c0_4 = arith.constant 0 : index
    %c2 = arith.constant 2 : index
    %c0_5 = arith.constant 0 : index
    %13 = vector.load %arg2[%c0_4, %c2, %c0_5] : memref<2x4x256xf32, #tpu.memory_space<vmem>>, vector<2x1x256xf32>
    %14 = vector.shape_cast %13 : vector<2x1x256xf32> to vector<2x256xf32>
    %15 = arith.cmpf ogt, %14, %10 : vector<2x256xf32>
    %16 = arith.cmpf one, %14, %14 : vector<2x256xf32>
    %17 = arith.cmpf oeq, %10, %10 : vector<2x256xf32>
    %18 = arith.andi %16, %17 : vector<2x256xi1>
    %19 = arith.ori %15, %18 : vector<2x256xi1>
    %20 = arith.select %19, %14, %10 : vector<2x256xi1>, vector<2x256xf32>
    %c2_i32 = arith.constant 2 : i32
    %21 = vector.broadcast %c2_i32 : i32 to vector<2x256xi32>
    %22 = arith.select %19, %21, %12 : vector<2x256xi1>, vector<2x256xi32>
    %c0_6 = arith.constant 0 : index
    %c3 = arith.constant 3 : index
    %c0_7 = arith.constant 0 : index
    %23 = vector.load %arg2[%c0_6, %c3, %c0_7] : memref<2x4x256xf32, #tpu.memory_space<vmem>>, vector<2x1x256xf32>
    %24 = vector.shape_cast %23 : vector<2x1x256xf32> to vector<2x256xf32>
    %25 = arith.cmpf ogt, %24, %20 : vector<2x256xf32>
    %26 = arith.cmpf one, %24, %24 : vector<2x256xf32>
    %27 = arith.cmpf oeq, %20, %20 : vector<2x256xf32>
    %28 = arith.andi %26, %27 : vector<2x256xi1>
    %29 = arith.ori %25, %28 : vector<2x256xi1>
    %c3_i32 = arith.constant 3 : i32
    %30 = vector.broadcast %c3_i32 : i32 to vector<2x256xi32>
    %31 = arith.select %29, %30, %22 : vector<2x256xi1>, vector<2x256xi32>
    %c0_8 = arith.constant 0 : index
    %c0_9 = arith.constant 0 : index
    %32 = vector.load %arg3[%c0_8, %c0_9] : memref<2x256xi32, #tpu.memory_space<vmem>>, vector<2x256xi32>
    tpu.vector_store %arg3[%c0_8, %c0_9], %31 {strides = array<i32>} : memref<2x256xi32, #tpu.memory_space<vmem>>, vector<2x256xi32>,
    return
  }
  func.func @transform_0(%arg0: i32, %arg1: i32) -> (i32, i32, i32) {
    %c0_i32 = arith.constant 0 : i32
    %c0_i32_0 = arith.constant 0 : i32
    return %arg0, %c0_i32, %arg1 : i32, i32, i32
  }
  func.func @transform_1(%arg0: i32, %arg1: i32) -> (i32, i32) {
    %c0_i32 = arith.constant 0 : i32
    return %arg0, %arg1 : i32, i32
  }
}

</mosaic_0001>

<bundles_post_ra>
// kernel: tpu_custom_call.1
= control target key start
LH: loop header
LB: loop body
LE: loop exit
PB: predicated region body
PF: predicated region fallthrough
CT: control target
= control target key end

     0   :  { %6 = vsyncpa [#allocation3], 0  ;;  %s188_s0 = inlined_call_operand.hbm [shape: f32[2,4,256], index: 0, kind: input, shape index: {}]   ;;  %s189_s1 = inlined_call_operand.hbm [shape: s32[2,256], index: 1, kind: output, shape index: {}]  }
   0x1   :  { %7 = vsyncpa [#allocation4], 0  ;;  %s12_s8 = sshll.u32 %s188_s0, 4  ;;  %s159_s9 = smov [#allocation2]   ;;  %s13_s8 = int_to_ptr.hbm [resolvable:$true] %s12_s8 }
   0x2   :  { %s14_s10 = sshll.u32 %s159_s9, 4  ;;  %s160_s11 = smov 128   ;;  %s15_s10 = int_to_ptr.vmem [resolvable:$true] %s14_s10 }
   0x3   :  { %s161_s12 = smov 8  }
   0x4   :  { %20 = dma.hbm_to_vmem [thread:$0]  %s13_s8, 256, %s15_s10, [#allocation3], %s160_s11, %s160_s11, %s161_s12  }
   0x5   :  { %155 = dma.done.wait [#allocation3], 256  }
   0x6   :  { %156 = vsyncadd [#allocation3], 4294967040  ;;  %v25_v0 = vld [vmem:[#allocation2] ss:$4 sm:$0x3]  ;;  %v162_v8 = vmov 0  }
   0x7   :  { %v29_v1 = vld [vmem:[#allocation2 + $0x1] ss:$4 sm:$0x3]  ;;  %vm36_vm2 = vcmp.eq.f32.partialorder %v25_v0, %v25_v0  ;;  %v47_v2 = vld [vmem:[#allocation2 + $0x2] ss:$4 sm:$0x3] }
   0x8   :  { %vm32_vm0 = vcmp.gt.f32.partialorder %v29_v1, %v25_v0  ;;  %vm34_vm1 = vcmp.ne.f32.partialorder %v29_v1, %v29_v1  ;;  %v27_v3 = vld [vmem:[#allocation2 + $0x8] ss:$4 sm:$0x3]  ;;  %v31_v4 = vld [vmem:[#allocation2 + $0x9] ss:$4 sm:$0x3]  ;;  %vm52_vm5 = vcmp.ne.f32.partialorder %v47_v2, %v47_v2 }
   0x9   :  { %vm38_vm3 = vmand %vm34_vm1, %vm36_vm2  ;;  %vm33_vm6 = vcmp.gt.f32.partialorder %v31_v4, %v27_v3  ;;  %vm35_vm7 = vcmp.ne.f32.partialorder %v31_v4, %v31_v4  ;;  %vm37_vm8 = vcmp.eq.f32.partialorder %v27_v3, %v27_v3  ;;  %v49_v5 = vld [vmem:[#allocation2 + $0xa] ss:$4 sm:$0x3]  ;;  %v65_v7 = vld [vmem:[#allocation2 + $0x3] ss:$4 sm:$0x3] }
   0xa   :  { %vm40_vm4 = vmor %vm32_vm0, %vm38_vm3  ;;  %vm53_vm13 = vcmp.ne.f32.partialorder %v49_v5, %v49_v5  ;;  %v67_v11 = vld [vmem:[#allocation2 + $0xb] ss:$4 sm:$0x3]  ;;  %vm70_vm0 = vcmp.ne.f32.partialorder %v65_v7, %v65_v7  ;;  %s163_s0 = smov [#allocation5]   ;;  %s92_s16 = sshll.u32 %s189_s1, 4  ;;  %s93_s16 = int_to_ptr.hbm [resolvable:$true] %s92_s16 }
   0xb   :  { %v42_v6 = vsel %vm40_vm4, %v29_v1, %v25_v0  ;;  %vm39_vm9 = vmand %vm35_vm7, %vm37_vm8  ;;  %v44_v9 = vsel %vm40_vm4, 1, %v162_v8  ;;  %vm71_vm7 = vcmp.ne.f32.partialorder %v67_v11, %v67_v11  ;;  %s90_s13 = sshll.u32 %s163_s0, 4  ;;  %s91_s13 = int_to_ptr.vmem [resolvable:$true] %s90_s13 }
   0xc   :  { %vm50_vm10 = vcmp.gt.f32.partialorder %v47_v2, %v42_v6  ;;  %vm54_vm11 = vcmp.eq.f32.partialorder %v42_v6, %v42_v6  ;;  %vm41_vm12 = vmor %vm33_vm6, %vm39_vm9 }
   0xd   :  { %vm56_vm14 = vmand %vm52_vm5, %vm54_vm11  ;;  %v43_v10 = vsel %vm41_vm12, %v31_v4, %v27_v3  ;;  %v45_v14 = vsel %vm41_vm12, 1, %v162_v8 }
   0xe   :  { %vm177_vm15 = vmor %vm50_vm10, %vm56_vm14  ;;  %vm51_vm1 = vcmp.gt.f32.partialorder %v49_v5, %v43_v10  ;;  %vm55_vm2 = vcmp.eq.f32.partialorder %v43_v10, %v43_v10 }
   0xf   :  { %v60_v13 = vsel %vm177_vm15, %v47_v2, %v42_v6  ;;  %vm57_vm3 = vmand %vm53_vm13, %vm55_vm2  ;;  %v62_v15 = vsel %vm177_vm15, 2, %v44_v9 }
  0x10   :  { %vm68_vm6 = vcmp.gt.f32.partialorder %v65_v7, %v60_v13  ;;  %vm72_vm4 = vcmp.eq.f32.partialorder %v60_v13, %v60_v13  ;;  %vm59_vm5 = vmor %vm51_vm1, %vm57_vm3 }
  0x11   :  { %vm74_vm8 = vmand %vm70_vm0, %vm72_vm4  ;;  %v61_v16 = vsel %vm59_vm5, %v49_v5, %v43_v10  ;;  %v63_v17 = vsel %vm59_vm5, 2, %v45_v14 }
  0x12   :  { %vm76_vm9 = vmor %vm68_vm6, %vm74_vm8  ;;  %vm69_vm10 = vcmp.gt.f32.partialorder %v67_v11, %v61_v16  ;;  %vm73_vm11 = vcmp.eq.f32.partialorder %v61_v16, %v61_v16 }
  0x13   :  { %v78_v18 = vsel %vm76_vm9, 3, %v62_v15  ;;  %vm75_vm14 = vmand %vm71_vm7, %vm73_vm11 }
  0x14   :  { %80 = vst [vmem:[#allocation1] ss:$2 sm:$0xff] %v78_v18  ;;  %vm77_vm12 = vmor %vm69_vm10, %vm75_vm14 }
  0x15   :  { %v79_v19 = vsel %vm77_vm12, 3, %v63_v17 }
  0x16   :  { %82 = vst [vmem:[#allocation1 + $0x1] ss:$2 sm:$0xff] %v79_v19 }
  0x1d   :  { %v83_v20 = vld [vmem:[#allocation1] sm:$0xff] }
  0x1e   :  { %84 = vst [vmem:[#allocation5] sm:$0xf] %v83_v20 }
  0x1f   :  { %95 = dma.vmem_to_hbm [thread:$0]  %s91_s13, 64, %s93_s16, [#allocation4]  }
  0x20   :  { %157 = dma.done.wait [#allocation4], 64  }
  0x21   :  { %158 = vsyncadd [#allocation4], 4294967232 }
  0x22   :  { %100 = vsyncpa [#allocation3], 1 }
  0x23   :  { %101 = vsyncpa [#allocation4], 1 }

</bundles_post_ra>
